<compile_context>
chip_gen: v6e
topology: v6e:2x2x1
jax: 0.10.0
libtpu: 0.0.40
codegen_flags: <defaults>
</compile_context>

<pallas_src>
import jax
import jax.numpy as jnp
from jax.experimental import pallas as pl
from jax.experimental.pallas import tpu as pltpu

NEG_SLOPE = 0.01  # nn.LeakyReLU default negative_slope
BN_EPS = 1e-5     # nn.BatchNorm1d default eps


def _round_up(x, m):
    return ((x + m - 1) // m) * m


def _leaky_relu(x):
    return jnp.where(x >= 0, x, NEG_SLOPE * x)


def embedding_kernel(x_ref, w1_ref, t1_ref, w2_ref, t2_ref, o_ref):
    # Layer 1: Linear (scale pre-folded into W1) + shift + LeakyReLU, f32 acc.
    h = jnp.dot(x_ref[...], w1_ref[...], preferred_element_type=jnp.float32)
    h = _leaky_relu(h + t1_ref[...])
    # Layer 2: Linear (scale pre-folded into W2, lane-padded) + shift + LeakyReLU.
    z = jnp.dot(h.astype(w2_ref.dtype), w2_ref[...],
                preferred_element_type=jnp.float32)
    z = _leaky_relu(z + t2_ref[...])
    o_ref[...] = z.astype(o_ref.dtype)


def embedding_forward(x, params, *, tm=512, compute_dtype=jnp.bfloat16):
    """x: [N, in_channels] float32 -> [N, out_channels] float32 (eval-mode)."""
    N, c_in = x.shape
    w1, b1, g1, beta1, rm1, rv1 = params["layer1"]
    w2, b2, g2, beta2, rm2, rv2 = params["layer2"]
    c_mid = w1.shape[1]
    c_out = w2.shape[1]

    # ---- parameter prep (glue; hoist out of the hot path if weights are static)
    scale1 = g1 / jnp.sqrt(rv1 + BN_EPS)
    shift1 = (b1 - rm1) * scale1 + beta1
    scale2 = g2 / jnp.sqrt(rv2 + BN_EPS)
    shift2 = (b2 - rm2) * scale2 + beta2

    w1f = (w1 * scale1[None, :]).astype(compute_dtype)
    w2f = w2 * scale2[None, :]

    # Lane-dense output: pad c_out to a multiple of 128 (unmasked vst stores).
    c_out_p = _round_up(c_out, 128)
    if c_out_p != c_out:
        w2f = jnp.pad(w2f, ((0, 0), (0, c_out_p - c_out)))
        shift2 = jnp.pad(shift2, (0, c_out_p - c_out))
    w2f = w2f.astype(compute_dtype)

    t1 = shift1.reshape(1, c_mid).astype(jnp.float32)    # affine kept in f32
    t2 = shift2.reshape(1, c_out_p).astype(jnp.float32)

    # ---- row tiling: big tiles amortize per-step overhead; adapt for small N.
    tm_eff = min(tm, _round_up(N, 8))
    n_pad = _round_up(N, tm_eff)
    xp = x if n_pad == N else jnp.pad(x, ((0, n_pad - N), (0, 0)))
    xp = xp.astype(compute_dtype)

    grid = (n_pad // tm_eff,)

    itemsize = jnp.dtype(compute_dtype).itemsize
    cost = pl.CostEstimate(
        flops=2 * n_pad * (c_in * c_mid + c_mid * c_out_p),
        transcendentals=0,
        bytes_accessed=(xp.size * itemsize
                        + w1f.size * itemsize
                        + w2f.size * itemsize
                        + t1.size * 4 + t2.size * 4
                        + n_pad * c_out_p * itemsize),
    )

    out = pl.pallas_call(
        embedding_kernel,
        out_shape=jax.ShapeDtypeStruct((n_pad, c_out_p), compute_dtype),
        grid_spec=pltpu.PrefetchScalarGridSpec(
            num_scalar_prefetch=0,
            grid=grid,
            in_specs=[
                pl.BlockSpec((tm_eff, c_in), lambda i: (i, 0)),     # x tile
                pl.BlockSpec((c_in, c_mid), lambda i: (0, 0)),      # W1 (folded)
                pl.BlockSpec((1, c_mid), lambda i: (0, 0)),         # shift1
                pl.BlockSpec((c_mid, c_out_p), lambda i: (0, 0)),   # W2 (folded, padded)
                pl.BlockSpec((1, c_out_p), lambda i: (0, 0)),       # shift2
            ],
            out_specs=pl.BlockSpec((tm_eff, c_out_p), lambda i: (i, 0)),
        ),
        compiler_params=pltpu.CompilerParams(
            dimension_semantics=("parallel",),
            vmem_limit_bytes=32 * 1024 * 1024,
        ),
        cost_estimate=cost,
    )(xp, w1f, t1, w2f, t2)

    # Strip row / lane padding and return in the input dtype.
    return out[:N, :c_out].astype(x.dtype)


def init_params(key, in_channels, out_channels, mid_channels=32):
    """Synthetic parameters matching the PyTorch module's shapes.

    PyTorch nn.Linear weight is [out, in]; we store the transpose [in, out]."""
    ks = jax.random.split(key, 12)
    w1 = jax.random.normal(ks[0], (in_channels, mid_channels), jnp.float32) * 0.1
    b1 = jax.random.normal(ks[1], (mid_channels,), jnp.float32) * 0.1
    g1 = 1.0 + 0.1 * jax.random.normal(ks[2], (mid_channels,), jnp.float32)
    beta1 = 0.1 * jax.random.normal(ks[3], (mid_channels,), jnp.float32)
    rm1 = 0.05 * jax.random.normal(ks[4], (mid_channels,), jnp.float32)
    rv1 = 1.0 + 0.05 * jnp.abs(jax.random.normal(ks[5], (mid_channels,), jnp.float32))

    w2 = jax.random.normal(ks[6], (mid_channels, out_channels), jnp.float32) * 0.1
    b2 = jax.random.normal(ks[7], (out_channels,), jnp.float32) * 0.1
    g2 = 1.0 + 0.1 * jax.random.normal(ks[8], (out_channels,), jnp.float32)
    beta2 = 0.1 * jax.random.normal(ks[9], (out_channels,), jnp.float32)
    rm2 = 0.05 * jax.random.normal(ks[10], (out_channels,), jnp.float32)
    rv2 = 1.0 + 0.05 * jnp.abs(jax.random.normal(ks[11], (out_channels,), jnp.float32))

    return {
        "layer1": (w1, b1, g1, beta1, rm1, rv1),
        "layer2": (w2, b2, g2, beta2, rm2, rv2),
    }


def reference_forward(x, params):
    """Pure-JAX reference (eval-mode) for correctness checking."""
    w1, b1, g1, beta1, rm1, rv1 = params["layer1"]
    w2, b2, g2, beta2, rm2, rv2 = params["layer2"]
    h = x @ w1 + b1
    h = g1 * (h - rm1) / jnp.sqrt(rv1 + BN_EPS) + beta1
    h = jnp.where(h >= 0, h, NEG_SLOPE * h)
    z = h @ w2 + b2
    z = g2 * (z - rm2) / jnp.sqrt(rv2 + BN_EPS) + beta2
    z = jnp.where(z >= 0, z, NEG_SLOPE * z)
    return z


if __name__ == "__main__":
    key = jax.random.PRNGKey(0)
    kx, kp = jax.random.split(key)

    # Small demo shapes; N deliberately not a tile multiple to exercise padding.
    N, in_channels, mid_channels, out_channels = 300, 16, 32, 64
    x = jax.random.normal(kx, (N, in_channels), jnp.float32)
    params = init_params(kp, in_channels, out_channels, mid_channels)

    ref = reference_forward(x, params)

    # f32 path: tight correctness check (grid of 3 tiles at tm=128).
    out_f32 = jax.block_until_ready(
        embedding_forward(x, params, tm=128, compute_dtype=jnp.float32))
    assert out_f32.shape == (N, out_channels)
    assert jnp.allclose(out_f32, ref, atol=1e-4, rtol=1e-4), "f32 mismatch vs reference"

    # bf16 path (default, memory-bound-optimized): loose check.
    out_bf16 = jax.block_until_ready(
        embedding_forward(x, params, tm=128, compute_dtype=jnp.bfloat16))
    assert out_bf16.shape == (N, out_channels)
    assert jnp.allclose(out_bf16, ref, atol=5e-2, rtol=5e-2), "bf16 mismatch vs reference"

    print("KERNEL_OK")
</pallas_src>

<mosaic_0001>
module attributes {stable_mosaic.version = 11 : i64} {
  func.func @embedding_kernel(%arg0: i32, %arg1: memref<128x16xf32, #tpu.memory_space<vmem>>, %arg2: memref<16x32xf32, #tpu.memory_space<vmem>>, %arg3: memref<1x32xf32, #tpu.memory_space<vmem>>, %arg4: memref<32x128xf32, #tpu.memory_space<vmem>>, %arg5: memref<1x128xf32, #tpu.memory_space<vmem>>, %arg6: memref<128x128xf32, #tpu.memory_space<vmem>>) attributes {dimension_semantics = [#tpu.dimension_semantics<parallel>], iteration_bounds = array<i64: 3>, scalar_prefetch = 0 : i64, scratch_operands = 0 : i64, tpu.core_type = #tpu.core_type<tc>, window_params = [{transform_indices = @transform_0, window_bounds = array<i64: 128, 16>}, {pipeline_mode = #tpu.pipeline_mode<synchronous>, transform_indices = @transform_1, window_bounds = array<i64: 16, 32>}, {pipeline_mode = #tpu.pipeline_mode<synchronous>, transform_indices = @transform_2, window_bounds = array<i64: 1, 32>}, {pipeline_mode = #tpu.pipeline_mode<synchronous>, transform_indices = @transform_3, window_bounds = array<i64: 32, 128>}, {pipeline_mode = #tpu.pipeline_mode<synchronous>, transform_indices = @transform_4, window_bounds = array<i64: 1, 128>}, {transform_indices = @transform_5, window_bounds = array<i64: 128, 128>}]} {
    %c0 = arith.constant 0 : index
    %c0_0 = arith.constant 0 : index
    %0 = vector.load %arg1[%c0, %c0_0] : memref<128x16xf32, #tpu.memory_space<vmem>>, vector<128x16xf32>
    %c0_1 = arith.constant 0 : index
    %c0_2 = arith.constant 0 : index
    %1 = vector.load %arg2[%c0_1, %c0_2] : memref<16x32xf32, #tpu.memory_space<vmem>>, vector<16x32xf32>
    %cst = arith.constant dense<0.000000e+00> : vector<128x32xf32>
    %2 = tpu.matmul %0, %1, %cst {dimension_numbers = #tpu.dot_dimension_numbers<[1], [0], [0], [1], [0, 0, 1, 1], [], []>} : vector<128x16xf32>, vector<16x32xf32>, vector<128x32xf32> -> vector<128x32xf32>
    %c0_3 = arith.constant 0 : index
    %c0_4 = arith.constant 0 : index
    %3 = vector.load %arg3[%c0_3, %c0_4] : memref<1x32xf32, #tpu.memory_space<vmem>>, vector<1x32xf32>
    %4 = vector.broadcast %3 : vector<1x32xf32> to vector<128x32xf32>
    %5 = arith.addf %2, %4 : vector<128x32xf32>
    %cst_5 = arith.constant 0.000000e+00 : f32
    %6 = vector.broadcast %cst_5 : f32 to vector<128x32xf32>
    %7 = arith.cmpf oge, %5, %6 : vector<128x32xf32>
    %cst_6 = arith.constant 0.00999999977 : f32
    %8 = vector.broadcast %cst_6 : f32 to vector<128x32xf32>
    %9 = arith.mulf %8, %5 : vector<128x32xf32>
    %10 = arith.select %7, %5, %9 : vector<128x32xi1>, vector<128x32xf32>
    %c0_7 = arith.constant 0 : index
    %c0_8 = arith.constant 0 : index
    %11 = vector.load %arg4[%c0_7, %c0_8] : memref<32x128xf32, #tpu.memory_space<vmem>>, vector<32x128xf32>
    %cst_9 = arith.constant dense<0.000000e+00> : vector<128x128xf32>
    %12 = tpu.matmul %10, %11, %cst_9 {dimension_numbers = #tpu.dot_dimension_numbers<[1], [0], [0], [1], [0, 0, 1, 1], [], []>} : vector<128x32xf32>, vector<32x128xf32>, vector<128x128xf32> -> vector<128x128xf32>
    %c0_10 = arith.constant 0 : index
    %c0_11 = arith.constant 0 : index
    %13 = vector.load %arg5[%c0_10, %c0_11] : memref<1x128xf32, #tpu.memory_space<vmem>>, vector<1x128xf32>
    %14 = vector.broadcast %13 : vector<1x128xf32> to vector<128x128xf32>
    %15 = arith.addf %12, %14 : vector<128x128xf32>
    %cst_12 = arith.constant 0.000000e+00 : f32
    %16 = vector.broadcast %cst_12 : f32 to vector<128x128xf32>
    %17 = arith.cmpf oge, %15, %16 : vector<128x128xf32>
    %cst_13 = arith.constant 0.00999999977 : f32
    %18 = vector.broadcast %cst_13 : f32 to vector<128x128xf32>
    %19 = arith.mulf %18, %15 : vector<128x128xf32>
    %20 = arith.select %17, %15, %19 : vector<128x128xi1>, vector<128x128xf32>
    %c0_14 = arith.constant 0 : index
    %c0_15 = arith.constant 0 : index
    %21 = vector.load %arg6[%c0_14, %c0_15] : memref<128x128xf32, #tpu.memory_space<vmem>>, vector<128x128xf32>
    tpu.vector_store %arg6[%c0_14, %c0_15], %20 {strides = array<i32>} : memref<128x128xf32, #tpu.memory_space<vmem>>, vector<128x128xf32>,
    return
  }
  func.func @transform_0(%arg0: i32) -> (i32, i32) {
    %c0_i32 = arith.constant 0 : i32
    %c0_i32_0 = arith.constant 0 : i32
    return %arg0, %c0_i32 : i32, i32
  }
  func.func @transform_1(%arg0: i32) -> (i32, i32) {
    %c0_i32 = arith.constant 0 : i32
    %c0_i32_0 = arith.constant 0 : i32
    %c0_i32_1 = arith.constant 0 : i32
    return %c0_i32, %c0_i32_0 : i32, i32
  }
  func.func @transform_2(%arg0: i32) -> (i32, i32) {
    %c0_i32 = arith.constant 0 : i32
    %c0_i32_0 = arith.constant 0 : i32
    %c0_i32_1 = arith.constant 0 : i32
    return %c0_i32, %c0_i32_0 : i32, i32
  }
  func.func @transform_3(%arg0: i32) -> (i32, i32) {
    %c0_i32 = arith.constant 0 : i32
    %c0_i32_0 = arith.constant 0 : i32
    %c0_i32_1 = arith.constant 0 : i32
    return %c0_i32, %c0_i32_0 : i32, i32
  }
  func.func @transform_4(%arg0: i32) -> (i32, i32) {
    %c0_i32 = arith.constant 0 : i32
    %c0_i32_0 = arith.constant 0 : i32
    %c0_i32_1 = arith.constant 0 : i32
    return %c0_i32, %c0_i32_0 : i32, i32
  }
  func.func @transform_5(%arg0: i32) -> (i32, i32) {
    %c0_i32 = arith.constant 0 : i32
    %c0_i32_0 = arith.constant 0 : i32
    return %arg0, %c0_i32 : i32, i32
  }
}

</mosaic_0001>

<bundles_post_ra>
// kernel: tpu_custom_call.1
= control target key start
LH: loop header
LB: loop body
LE: loop exit
PB: predicated region body
PF: predicated region fallthrough
CT: control target
= control target key end

     0   :  { %10 = vsyncpa [#allocation3], 0  ;;  %s1353_s0 = inlined_call_operand.vmem [shape: f32[384,16], index: 0, kind: input, shape index: {}]   ;;  %s1354_s1 = inlined_call_operand.vmem [shape: f32[16,32], index: 1, kind: input, shape index: {}]   ;;  %s1355_s2 = inlined_call_operand.vmem [shape: f32[1,32], index: 2, kind: input, shape index: {}]   ;;  %s1356_s3 = inlined_call_operand.vmem [shape: f32[32,128], index: 3, kind: input, shape index: {}]   ;;  %s1357_s4 = inlined_call_operand.vmem [shape: f32[1,128], index: 4, kind: input, shape index: {}]   ;;  %s1358_s5 = inlined_call_operand.hbm [shape: f32[384,128], index: 5, kind: output, shape index: {}]  }
   0x1   :  { %12 = vsyncpa [#allocation3 + $0x1], 0  ;;  %s1119_s18 = smov 0   ;;  %s1121_s19 = smov 0  }
   0x2   :  { %s1123_s20 = smov 0   ;;  %s1125_s21 = smov 0  }
   0x3 LB: > { %s1140_s22 = sadd.s32 4294967295, %s1084_s21   ;;  %s838_s23 = sadd.s32 4294967294, %s1084_s21   ;;  %s1084_s21 = sphi %s1125_s21, %s1364_s21   ;;  %s1080_s20 = sphi %s1123_s20, %s1363_s20   ;;  %s1076_s19 = sphi %s1121_s19, %s1362_s19   ;;  %s1072_s18 = sphi %s1119_s18, %s1361_s18  }
   0x4   : > { %s1144_s24 = sadd.s32 1, %s1084_s21   ;;  %s135_s25 = sadd.s32 1, %s1080_s20 }
   0x5   : > { %s132_s26 = ssub.s32 %s1084_s21, %s1144_s24  ;;  %p145_p0 = scmp.ne.s32.totalorder %s1080_s20, %s1076_s19 }
   0x6   : > { %p133_p1 = scmp.eq.s32.totalorder %s132_s26, 0  ;;  %p146_p2 = scmp.eq.s32.totalorder %s1140_s22, 2 }
   0x7   : > { %p151_p3 = scmp.ne.s32.totalorder %s1076_s19, %s1072_s18  ;;  %p152_p4 = scmp.eq.s32.totalorder %s838_s23, 2 }
   0x8   : > { %s1155_s27 = scalar_select %p133_p1, %s1080_s20, %s135_s25  }
   0x9   : > { %p1157_p5 = por %p146_p2, %p145_p0  ;;  %p1161_p6 = por %p152_p4, %p151_p3 }
   0xa   : > { %p841_p7 = scmp.ge.s32.totalorder %s1084_s21, 1  ;;  %p191_p8 = scmp.lt.s32.totalorder %s1084_s21, 4 }
   0xc   : > { %p192_p9 = pnand %p841_p7, %p191_p8 }
   0xd   : > { %s843_s9 = sshll.u32 (!%p192_p9), %s1140_s22, 4  ;;  %s216_s8 = sand.u32 (!%p192_p9), 1, %s1076_s19  }
   0xe   : > { %195 = sbr.rel (%p192_p9) target bundleno = 467 (0x1d3), region = 40  ;;  %p220_p10 = scmp.lt.s32.totalorder (!%p192_p9), %s843_s9, 47 }
   0xf   : > { %s842_s11 = sshll.u32 (!%p192_p9), %s216_s8, 7  ;;  %s1086_s25 = smov (!%p192_p9), [#allocation2]  }
  0x10   : > { %s1271_s12 = scalar_lea.vmem (!%p192_p9), [#allocation2], %s842_s11  ;;  %s1028_s26 = sshll.u32 (!%p192_p9), %s1086_s25, 4  ;;  %s1029_s26 = int_to_ptr.vmem [resolvable:$false] %s1028_s26 }
  0x11   : > { %s776_s14 = sshll.u32 (!%p192_p9), %s1271_s12, 4  ;;  %s1030_s30 = scalar_lea.vmem (!%p192_p9), %s1029_s26, 4096  ;;  %s1307_s14 = int_to_ptr.vmem [resolvable:$true] %s776_s14 }
  0x12   : > { %s1024_s23 = scalar_lea.vmem (!%p192_p9), %s1307_s14, 2048  ;;  %p1031_p0 = scmp.lt.s32.totalorder (!%p192_p9), %s1307_s14, %s1029_s26 }
  0x13   : > { %v243_v0 = vld [vmem:[%s1354_s1 + $0x8] sm:$0xff]  ;;  %v242_v1 = vld [vmem:[%s1354_s1] sm:$0xff]  ;;  %s1366_s9 = smov (!%p220_p10, %s843_s9), 47  ;;  %vm251_vm0 = vcmask 130048   ;;  %v496_v18 = vld [vmem:[%s1356_s3 + $0x18] sm:$0xff]  ;;  %vm504_vm1 = vcmask 261120   ;;  %p1025_p11 = scmp.ne.s32.totalorder %s1307_s14, %s1024_s23 }
  0x14   : > { %923 = vmatprep.subr.mxu0 %v243_v0  ;;  %s844_s10 = sshll.u32 %s1366_s9, 3  ;;  %951 = vmatprep.subr.mxu1 %v496_v18  ;;  %v495_v19 = vld [vmem:[%s1356_s3 + $0x10] sm:$0xff]  ;;  %v494_v20 = vld [vmem:[%s1356_s3 + $0x8] sm:$0xff]  ;;  %v493_v21 = vld [vmem:[%s1356_s3] sm:$0xff]  ;;  %p1032_p1 = scmp.lt.s32.totalorder %s1030_s30, %s1024_s23 }
  0x15   : > { %924 = vmatpush3.msra.mxu0 %v243_v0  ;;  %s1177_s13 = scalar_lea.vmem %s1353_s0, %s844_s10  ;;  %952 = vmatpush3.msra.mxu1 %v496_v18  ;;  %v1226_v22 = vld [vmem:[%s1355_s2] ss:$0 sm:$0xff]  ;;  %p1026_p12 = pnand %p1025_p11, %p1157_p5 }
  0x16   : > { %925 = vmatprep.subr.mxu0 %v242_v1  ;;  %v226_v2 = vld [vmem:[%s1177_s13] sm:$0xff]  ;;  %v227_v3 = vld [vmem:[%s1177_s13 + $0x8] sm:$0xff]  ;;  %v228_v4 = vld [vmem:[%s1177_s13 + $0x10] sm:$0xff]  ;;  %953 = vmatprep.subr.mxu1 %v495_v19  ;;  %p1033_p2 = por %p1032_p1, %p1031_p0 }
  0x17   : > { %926 = vmatpush3.msra.mxu0 %v242_v1  ;;  %927 = vmatprep.mubr.msk.f32.mxu0 %vm251_vm0, %v226_v2  ;;  %v229_v5 = vld [vmem:[%s1177_s13 + $0x18] sm:$0xff]  ;;  %v230_v6 = vld [vmem:[%s1177_s13 + $0x20] sm:$0xff]  ;;  %v231_v7 = vld [vmem:[%s1177_s13 + $0x28] sm:$0xff]  ;;  %p1027_p13 = pneg %p1026_p12 }
  0x18   : > { %928 = vmatmul.mubr.msk.f32.vlgmr.msra.gmra.mxu0 %vm251_vm0, %v227_v3  ;;  %v232_v8 = vld [vmem:[%s1177_s13 + $0x30] sm:$0xff]  ;;  %v233_v9 = vld [vmem:[%s1177_s13 + $0x38] sm:$0xff]  ;;  %v234_v10 = vld [vmem:[%s1177_s13 + $0x40] sm:$0xff]  ;;  %954 = vmatpush3.msra.mxu1 %v495_v19 }
  0x19   : > { %930 = vmatprep.mubr.msk.f32.mxu0 %vm251_vm0, %v228_v4  ;;  %v235_v11 = vld [vmem:[%s1177_s13 + $0x48] sm:$0xff]  ;;  %v236_v12 = vld [vmem:[%s1177_s13 + $0x50] sm:$0xff]  ;;  %v237_v13 = vld [vmem:[%s1177_s13 + $0x58] sm:$0xff]  ;;  %955 = vmatprep.subr.mxu1 %v494_v20  ;;  %p1034_p3 = pnand %p1033_p2, %p1027_p13 }
  0x1a   : > { %v238_v14 = vld [vmem:[%s1177_s13 + $0x60] sm:$0xff]  ;;  %v239_v15 = vld [vmem:[%s1177_s13 + $0x68] sm:$0xff]  ;;  %v240_v16 = vld [vmem:[%s1177_s13 + $0x70] sm:$0xff]  ;;  %956 = vmatpush3.msra.mxu1 %v494_v20 }
  0x1b   : > { %v241_v17 = vld [vmem:[%s1177_s13 + $0x78] sm:$0xff]  ;;  %957 = vmatprep.subr.mxu1 %v493_v21  ;;  %s884_s13 = sshll.u32 %s1140_s22, 11  ;;  %s1313_s22 = scalar_lea.sflag [#allocation3], %s216_s8 }
  0x1c   : > { %931 = vmatmul.mubr.msk.f32.gmra.mxu0 %vm251_vm0, %v229_v5  ;;  %958 = vmatpush3.msra.mxu1 %v493_v21  ;;  %s1305_s17 = scalar_lea.hbm %s1358_s5, %s884_s13 }
  0x1d   : > { %933 = vmatprep.mubr.msk.f32.mxu0 %vm251_vm0, %v230_v6 }
  0x20   : > { %934 = vmatmul.mubr.msk.f32.gmra.mxu0 %vm251_vm0, %v231_v7 }
  0x21   : > { %936 = vmatprep.mubr.msk.f32.mxu0 %vm251_vm0, %v232_v8 }
  0x24   : > { %937 = vmatmul.mubr.msk.f32.gmra.mxu0 %vm251_vm0, %v233_v9 }
  0x25   : > { %939 = vmatprep.mubr.msk.f32.mxu0 %vm251_vm0, %v234_v10 }
  0x28   : > { %940 = vmatmul.mubr.msk.f32.gmra.mxu0 %vm251_vm0, %v235_v11 }
  0x29   : > { %942 = vmatprep.mubr.msk.f32.mxu0 %vm251_vm0, %v236_v12 }
  0x2c   : > { %943 = vmatmul.mubr.msk.f32.gmra.mxu0 %vm251_vm0, %v237_v13 }
  0x2d   : > { %945 = vmatprep.mubr.msk.f32.mxu0 %vm251_vm0, %v238_v14 }
  0x30   : > { %946 = vmatmul.mubr.msk.f32.gmra.mxu0 %vm251_vm0, %v239_v15 }
  0x31   : > { %948 = vmatprep.mubr.msk.f32.mxu0 %vm251_vm0, %v240_v16 }
  0x34   : > { %949 = vmatmul.mubr.msk.f32.gmra.mxu0 %vm251_vm0, %v241_v17 }
  0xd8   : > { %v929_v23 = vpop.f32.mrf.mxu0 }
  0xd9   : > { %v372_v24 = vadd.f32 %v929_v23, %v1226_v22 }
  0xda   : > { %v366_v25 = vpop.f32.mrf.mxu0 }
  0xdb   : > { %v367_v26 = vadd.f32 %v1226_v22, %v366_v25  ;;  %v462_v27 = vmul.f32 0.01, %v372_v24  ;;  %vm446_vm2 = vcmp.ge.f32.partialorder %v372_v24, 0.0 }
  0xdc   : > { %v932_v28 = vpop.f32.mrf.mxu0 }
  0xdd   : > { %v382_v29 = vadd.f32 %v932_v28, %v1226_v22  ;;  %vm445_vm3 = vcmp.ge.f32.partialorder %v367_v26, 0.0  ;;  %v461_v30 = vmul.f32 0.01, %v367_v26  ;;  %v478_v36 = vsel %vm446_vm2, %v372_v24, %v462_v27 }
  0xde   : > { %v376_v31 = vpop.f32.mrf.mxu0 }
  0xdf   : > { %v377_v32 = vadd.f32 %v1226_v22, %v376_v31  ;;  %v477_v33 = vsel %vm445_vm3, %v367_v26, %v461_v30  ;;  %v464_v34 = vmul.f32 0.01, %v382_v29  ;;  %vm448_vm4 = vcmp.ge.f32.partialorder %v382_v29, 0.0 }
  0xe0   : > { %v935_v35 = vpop.f32.mrf.mxu0  ;;  %959 = vmatprep.mubr.msk.f32.mxu1 %vm504_vm1, %v477_v33 }
  0xe1   : > { %vm447_vm5 = vcmp.ge.f32.partialorder %v377_v32, 0.0  ;;  %v463_v37 = vmul.f32 0.01, %v377_v32  ;;  %v392_v38 = vadd.f32 %v935_v35, %v1226_v22  ;;  %960 = vmatmul.mubr.msk.f32.vlgmr.msra.gmra.mxu1 %vm504_vm1, %v478_v36  ;;  %v480_v44 = vsel %vm448_vm4, %v382_v29, %v464_v34 }
  0xe2   : > { %v386_v39 = vpop.f32.mrf.mxu0 }
  0xe3   : > { %v387_v40 = vadd.f32 %v1226_v22, %v386_v39  ;;  %v479_v41 = vsel %vm447_vm5, %v377_v32, %v463_v37  ;;  %v466_v42 = vmul.f32 0.01, %v392_v38  ;;  %vm450_vm6 = vcmp.ge.f32.partialorder %v392_v38, 0.0 }
  0xe4   : > { %v938_v43 = vpop.f32.mrf.mxu0  ;;  %962 = vmatprep.mubr.msk.f32.mxu1 %vm504_vm1, %v479_v41 }
  0xe5   : > { %vm449_vm7 = vcmp.ge.f32.partialorder %v387_v40, 0.0  ;;  %v465_v45 = vmul.f32 0.01, %v387_v40  ;;  %v402_v46 = vadd.f32 %v938_v43, %v1226_v22  ;;  %963 = vmatmul.mubr.msk.f32.gmra.mxu1 %vm504_vm1, %v480_v44  ;;  %v482_v52 = vsel %vm450_vm6, %v392_v38, %v466_v42 }
  0xe6   : > { %v396_v47 = vpop.f32.mrf.mxu0 }
  0xe7   : > { %v397_v48 = vadd.f32 %v1226_v22, %v396_v47  ;;  %v481_v49 = vsel %vm449_vm7, %v387_v40, %v465_v45  ;;  %v468_v50 = vmul.f32 0.01, %v402_v46  ;;  %vm452_vm8 = vcmp.ge.f32.partialorder %v402_v46, 0.0 }
  0xe8   : > { %v941_v51 = vpop.f32.mrf.mxu0  ;;  %965 = vmatprep.mubr.msk.f32.mxu1 %vm504_vm1, %v481_v49 }
  0xe9   : > { %vm451_vm9 = vcmp.ge.f32.partialorder %v397_v48, 0.0  ;;  %v467_v53 = vmul.f32 0.01, %v397_v48  ;;  %v412_v54 = vadd.f32 %v941_v51, %v1226_v22  ;;  %966 = vmatmul.mubr.msk.f32.gmra.mxu1 %vm504_vm1, %v482_v52  ;;  %v484_v60 = vsel %vm452_vm8, %v402_v46, %v468_v50 }
  0xea   : > { %v406_v55 = vpop.f32.mrf.mxu0 }
  0xeb   : > { %v407_v56 = vadd.f32 %v1226_v22, %v406_v55  ;;  %v483_v57 = vsel %vm451_vm9, %v397_v48, %v467_v53  ;;  %v470_v58 = vmul.f32 0.01, %v412_v54  ;;  %vm454_vm10 = vcmp.ge.f32.partialorder %v412_v54, 0.0 }
  0xec   : > { %v944_v59 = vpop.f32.mrf.mxu0  ;;  %968 = vmatprep.mubr.msk.f32.mxu1 %vm504_vm1, %v483_v57 }
  0xed   : > { %vm453_vm11 = vcmp.ge.f32.partialorder %v407_v56, 0.0  ;;  %v469_v61 = vmul.f32 0.01, %v407_v56  ;;  %v422_v62 = vadd.f32 %v944_v59, %v1226_v22  ;;  %969 = vmatmul.mubr.msk.f32.gmra.mxu1 %vm504_vm1, %v484_v60  ;;  %v486_v4 = vsel %vm454_vm10, %v412_v54, %v470_v58 }
  0xee   : > { %v416_v63 = vpop.f32.mrf.mxu0 }
  0xef   : > { %v417_v0 = vadd.f32 %v1226_v22, %v416_v63  ;;  %v485_v1 = vsel %vm453_vm11, %v407_v56, %v469_v61  ;;  %v472_v2 = vmul.f32 0.01, %v422_v62  ;;  %vm456_vm12 = vcmp.ge.f32.partialorder %v422_v62, 0.0 }
  0xf0   : > { %v947_v3 = vpop.f32.mrf.mxu0  ;;  %971 = vmatprep.mubr.msk.f32.mxu1 %vm504_vm1, %v485_v1 }
  0xf1   : > { %vm455_vm13 = vcmp.ge.f32.partialorder %v417_v0, 0.0  ;;  %v471_v5 = vmul.f32 0.01, %v417_v0  ;;  %v432_v6 = vadd.f32 %v947_v3, %v1226_v22  ;;  %972 = vmatmul.mubr.msk.f32.gmra.mxu1 %vm504_vm1, %v486_v4  ;;  %v488_v12 = vsel %vm456_vm12, %v422_v62, %v472_v2 }
  0xf2   : > { %v426_v7 = vpop.f32.mrf.mxu0 }
  0xf3   : > { %v427_v8 = vadd.f32 %v1226_v22, %v426_v7  ;;  %v487_v9 = vsel %vm455_vm13, %v417_v0, %v471_v5  ;;  %v474_v10 = vmul.f32 0.01, %v432_v6  ;;  %vm458_vm14 = vcmp.ge.f32.partialorder %v432_v6, 0.0 }
  0xf4   : > { %v950_v11 = vpop.f32.mrf.mxu0  ;;  %974 = vmatprep.mubr.msk.f32.mxu1 %vm504_vm1, %v487_v9 }
  0xf5   : > { %vm457_vm15 = vcmp.ge.f32.partialorder %v427_v8, 0.0  ;;  %v473_v13 = vmul.f32 0.01, %v427_v8  ;;  %v442_v14 = vadd.f32 %v950_v11, %v1226_v22  ;;  %975 = vmatmul.mubr.msk.f32.gmra.mxu1 %vm504_vm1, %v488_v12  ;;  %v490_v19 = vsel %vm458_vm14, %v432_v6, %v474_v10 }
  0xf6   : > { %v436_v15 = vpop.f32.mrf.mxu0 }
  0xf7   : > { %v437_v16 = vadd.f32 %v1226_v22, %v436_v15  ;;  %v489_v17 = vsel %vm457_vm15, %v427_v8, %v473_v13  ;;  %v476_v18 = vmul.f32 0.01, %v442_v14  ;;  %vm460_vm0 = vcmp.ge.f32.partialorder %v442_v14, 0.0  ;;  %v1264_v22 = vld [vmem:[%s1357_s4] ss:$0 sm:$0xff] }
  0xf8   : > { %977 = vmatprep.mubr.msk.f32.mxu1 %vm504_vm1, %v489_v17 }
  0xf9   : > { %vm459_vm2 = vcmp.ge.f32.partialorder %v437_v16, 0.0  ;;  %v475_v20 = vmul.f32 0.01, %v437_v16  ;;  %978 = vmatmul.mubr.msk.f32.gmra.mxu1 %vm504_vm1, %v490_v19  ;;  %v492_v23 = vsel %vm460_vm0, %v442_v14, %v476_v18 }
  0xfb   : > { %v491_v21 = vsel %vm459_vm2, %v437_v16, %v475_v20 }
  0xfc   : > { %980 = vmatprep.mubr.msk.f32.mxu1 %vm504_vm1, %v491_v21 }
  0xfd   : > { %981 = vmatmul.mubr.msk.f32.gmra.mxu1 %vm504_vm1, %v492_v23 }
 0x1a1   : > { %v961_v24 = vpop.f32.mrf.mxu1 }
 0x1a2   : > { %v625_v25 = vadd.f32 %v961_v24, %v1264_v22 }
 0x1a3   : > { %v619_v26 = vpop.f32.mrf.mxu1 }
 0x1a4   : > { %vm699_vm3 = vcmp.ge.f32.partialorder %v625_v25, 0.0  ;;  %v715_v27 = vmul.f32 0.01, %v625_v25  ;;  %v620_v28 = vadd.f32 %v1264_v22, %v619_v26 }
 0x1a5   : > { %v964_v29 = vpop.f32.mrf.mxu1 }
 0x1a6   : > { %v731_v30 = vsel %vm699_vm3, %v625_v25, %v715_v27  ;;  %vm698_vm4 = vcmp.ge.f32.partialorder %v620_v28, 0.0  ;;  %v714_v31 = vmul.f32 0.01, %v620_v28  ;;  %v635_v32 = vadd.f32 %v964_v29, %v1264_v22 }
 0x1a7   : > { %747 = vst [vmem:[%s1271_s12 + $0x8] sm:$0xff] %v731_v30  ;;  %v629_v33 = vpop.f32.mrf.mxu1 }
 0x1a8   : > { %v730_v34 = vsel %vm698_vm4, %v620_v28, %v714_v31  ;;  %vm701_vm1 = vcmp.ge.f32.partialorder %v635_v32, 0.0  ;;  %v717_v35 = vmul.f32 0.01, %v635_v32  ;;  %v630_v36 = vadd.f32 %v1264_v22, %v629_v33 }
 0x1a9   : > { %746 = vst [vmem:[%s1271_s12] sm:$0xff] %v730_v34  ;;  %v967_v37 = vpop.f32.mrf.mxu1 }
 0x1aa   : > { %v733_v38 = vsel %vm701_vm1, %v635_v32, %v717_v35  ;;  %vm700_vm5 = vcmp.ge.f32.partialorder %v630_v36, 0.0  ;;  %v716_v39 = vmul.f32 0.01, %v630_v36  ;;  %v645_v40 = vadd.f32 %v967_v37, %v1264_v22 }
 0x1ab   : > { %749 = vst [vmem:[%s1271_s12 + $0x18] sm:$0xff] %v733_v38  ;;  %v639_v41 = vpop.f32.mrf.mxu1 }
 0x1ac   : > { %v732_v42 = vsel %vm700_vm5, %v630_v36, %v716_v39  ;;  %vm703_vm6 = vcmp.ge.f32.partialorder %v645_v40, 0.0  ;;  %v719_v43 = vmul.f32 0.01, %v645_v40  ;;  %v640_v44 = vadd.f32 %v1264_v22, %v639_v41 }
 0x1ad   : > { %748 = vst [vmem:[%s1271_s12 + $0x10] sm:$0xff] %v732_v42  ;;  %v970_v45 = vpop.f32.mrf.mxu1 }
 0x1ae   : > { %v735_v46 = vsel %vm703_vm6, %v645_v40, %v719_v43  ;;  %vm702_vm7 = vcmp.ge.f32.partialorder %v640_v44, 0.0  ;;  %v718_v47 = vmul.f32 0.01, %v640_v44  ;;  %v655_v48 = vadd.f32 %v970_v45, %v1264_v22 }
 0x1af   : > { %751 = vst [vmem:[%s1271_s12 + $0x28] sm:$0xff] %v735_v46  ;;  %v649_v49 = vpop.f32.mrf.mxu1 }
 0x1b0   : > { %v734_v50 = vsel %vm702_vm7, %v640_v44, %v718_v47  ;;  %vm705_vm8 = vcmp.ge.f32.partialorder %v655_v48, 0.0  ;;  %v721_v51 = vmul.f32 0.01, %v655_v48  ;;  %v650_v52 = vadd.f32 %v1264_v22, %v649_v49 }
 0x1b1   : > { %750 = vst [vmem:[%s1271_s12 + $0x20] sm:$0xff] %v734_v50  ;;  %v973_v53 = vpop.f32.mrf.mxu1 }
 0x1b2   : > { %v737_v54 = vsel %vm705_vm8, %v655_v48, %v721_v51  ;;  %vm704_vm9 = vcmp.ge.f32.partialorder %v650_v52, 0.0  ;;  %v720_v55 = vmul.f32 0.01, %v650_v52  ;;  %v665_v56 = vadd.f32 %v973_v53, %v1264_v22 }
 0x1b3   : > { %753 = vst [vmem:[%s1271_s12 + $0x38] sm:$0xff] %v737_v54  ;;  %v659_v57 = vpop.f32.mrf.mxu1 }
 0x1b4   : > { %v736_v58 = vsel %vm704_vm9, %v650_v52, %v720_v55  ;;  %vm707_vm10 = vcmp.ge.f32.partialorder %v665_v56, 0.0  ;;  %v723_v59 = vmul.f32 0.01, %v665_v56  ;;  %v660_v60 = vadd.f32 %v1264_v22, %v659_v57 }
 0x1b5   : > { %752 = vst [vmem:[%s1271_s12 + $0x30] sm:$0xff] %v736_v58  ;;  %v976_v61 = vpop.f32.mrf.mxu1 }
 0x1b6   : > { %v739_v62 = vsel %vm707_vm10, %v665_v56, %v723_v59  ;;  %vm706_vm11 = vcmp.ge.f32.partialorder %v660_v60, 0.0  ;;  %v722_v63 = vmul.f32 0.01, %v660_v60  ;;  %v675_v0 = vadd.f32 %v976_v61, %v1264_v22 }
 0x1b7   : > { %755 = vst [vmem:[%s1271_s12 + $0x48] sm:$0xff] %v739_v62  ;;  %v669_v1 = vpop.f32.mrf.mxu1 }
 0x1b8   : > { %v738_v2 = vsel %vm706_vm11, %v660_v60, %v722_v63  ;;  %vm709_vm12 = vcmp.ge.f32.partialorder %v675_v0, 0.0  ;;  %v725_v3 = vmul.f32 0.01, %v675_v0  ;;  %v670_v4 = vadd.f32 %v1264_v22, %v669_v1 }
 0x1b9   : > { %754 = vst [vmem:[%s1271_s12 + $0x40] sm:$0xff] %v738_v2  ;;  %v979_v5 = vpop.f32.mrf.mxu1 }
 0x1ba   : > { %v741_v6 = vsel %vm709_vm12, %v675_v0, %v725_v3  ;;  %vm708_vm13 = vcmp.ge.f32.partialorder %v670_v4, 0.0  ;;  %v724_v7 = vmul.f32 0.01, %v670_v4  ;;  %v685_v8 = vadd.f32 %v979_v5, %v1264_v22 }
 0x1bb   : > { %757 = vst [vmem:[%s1271_s12 + $0x58] sm:$0xff] %v741_v6  ;;  %v679_v9 = vpop.f32.mrf.mxu1 }
 0x1bc   : > { %v740_v10 = vsel %vm708_vm13, %v670_v4, %v724_v7  ;;  %vm711_vm14 = vcmp.ge.f32.partialorder %v685_v8, 0.0  ;;  %v727_v11 = vmul.f32 0.01, %v685_v8  ;;  %v680_v12 = vadd.f32 %v1264_v22, %v679_v9 }
 0x1bd   : > { %756 = vst [vmem:[%s1271_s12 + $0x50] sm:$0xff] %v740_v10  ;;  %v982_v13 = vpop.f32.mrf.mxu1 }
 0x1be   : > { %v743_v14 = vsel %vm711_vm14, %v685_v8, %v727_v11  ;;  %vm710_vm15 = vcmp.ge.f32.partialorder %v680_v12, 0.0  ;;  %v726_v15 = vmul.f32 0.01, %v680_v12  ;;  %v695_v16 = vadd.f32 %v982_v13, %v1264_v22 }
 0x1bf   : > { %759 = vst [vmem:[%s1271_s12 + $0x68] sm:$0xff] %v743_v14  ;;  %v689_v17 = vpop.f32.mrf.mxu1 }
 0x1c0   : > { %v742_v18 = vsel %vm710_vm15, %v680_v12, %v726_v15  ;;  %vm713_vm0 = vcmp.ge.f32.partialorder %v695_v16, 0.0  ;;  %v729_v19 = vmul.f32 0.01, %v695_v16  ;;  %v690_v20 = vadd.f32 %v1264_v22, %v689_v17 }
 0x1c1   : > { %758 = vst [vmem:[%s1271_s12 + $0x60] sm:$0xff] %v742_v18 }
 0x1c2   : > { %v745_v21 = vsel %vm713_vm0, %v695_v16, %v729_v19  ;;  %vm712_vm2 = vcmp.ge.f32.partialorder %v690_v20, 0.0  ;;  %v728_v23 = vmul.f32 0.01, %v690_v20 }
 0x1c3   : > { %761 = vst [vmem:[%s1271_s12 + $0x78] sm:$0xff] %v745_v21 }
 0x1c4   : > { %v744_v24 = vsel %vm712_vm2, %v690_v20, %v728_v23 }
 0x1c5   : > { %760 = vst [vmem:[%s1271_s12 + $0x70] sm:$0xff] %v744_v24 }
 0x1c6   : > { %1037 = shalt.err (!%p1034_p3)
}
 0x1c7   : > { %s1038_s6 = scalar_lea.hbm %s1305_s17, 2048  ;;  %s1042_s9 = scalar_lea.hbm %s1358_s5, 6144 }
 0x1c8   : > { %p1039_p4 = scmp.ne.s32.totalorder %s1305_s17, %s1038_s6  ;;  %p1043_p9 = scmp.lt.s32.totalorder %s1305_s17, %s1358_s5 }
 0x1c9   : > { %p1044_p10 = scmp.lt.s32.totalorder %s1042_s9, %s1038_s6 }
 0x1ca   : > { %p1040_p7 = pnand %p1039_p4, %p1157_p5 }
 0x1cb   : > { %p1045_p11 = por %p1044_p10, %p1043_p9 }
 0x1cc   : > { %p1041_p8 = pneg %p1040_p7 }
 0x1ce   : > { %p1046_p12 = pnand %p1045_p11, %p1041_p8 }
 0x1d0   : > { %1049 = shalt.err (!%p1046_p12)
}
 0x1d1   : > { %s1087_s12 = smov 128   ;;  %s1088_s13 = smov 8  }
 0x1d2   : > { %983 = dma.vmem_to_hbm [thread:$0]  (%p1157_p5), %s1307_s14, 2048, %s1305_s17, %s1313_s22, %s1087_s12, %s1087_s12, %s1088_s13  }
 0x1d3 PF: > { %p989_p13 = scmp.ge.s32.totalorder %s1084_s21, 2  ;;  %s791_s15 = sand.u32 1, %s1072_s18  }
 0x1d4   : > { %s792_s16 = scalar_lea.sflag [#allocation3], %s791_s15 }
 0x1d5   : > { %p986_p0 = pnand %p989_p13, %p1161_p6 }
 0x1d7   : > { %p987_p1 = pneg %p986_p0 }
 0x1d9   : > { %1067 = dma.done.wait (%p987_p1), %s792_s16, 2048  }
 0x1da   : > { %1069 = vsyncadd (%p987_p1), %s792_s16, 4294965248  ;;  %p15_p2 = scmp.ge.s32.totalorder %s1144_s24, 5   ;;  %s1361_s18 = smov %s1076_s19 }
 0x1db   : > { %s1362_s19 = smov %s1080_s20  ;;  %s1363_s20 = smov %s1155_s27 }
 0x1dc   : > { %s1364_s21 = smov %s1144_s24  ;;  %17 = sbr.rel (!%p15_p2) target bundleno = 3 (0x3), region = 75 }
 0x1e1   :  { %797 = vsyncpa [#allocation3], 1 }
 0x1e2   :  { %799 = vsyncpa [#allocation3 + $0x1], 1 }

</bundles_post_ra>
